<compile_context>
chip_gen: v6e
topology: v6e:2x2x1
jax: 0.10.0
libtpu: 0.0.40
codegen_flags: <defaults>
</compile_context>

<pallas_src>
import jax
import jax.numpy as jnp
from jax.experimental import pallas as pl
from jax.experimental.pallas import tpu as pltpu


def _gnn_kernel(ei_ref, w_ref, xe_ref, xf_ref, w1e_ref, w1f_ref, b1_ref,
                w2_ref, b2_ref, wh_ref, bh_ref, out_ref):
    f32 = jnp.float32
    n = out_ref.shape[0]          # num nodes
    e = ei_ref.shape[1]           # num edges (without self loops)

    # ---- Build A_hat = D^-1/2 (A + I) D^-1/2 on-chip (no XLA scatter) ------
    ei = ei_ref[...]                                  # (2, E) int32
    src = ei[0:1, :]                                  # (1, E)
    dst = ei[1:2, :]                                  # (1, E)
    w = w_ref[...]                                    # (1, E) f32

    node_iota = jax.lax.broadcasted_iota(jnp.int32, (n, e), 0)
    oh_src = (node_iota == src).astype(f32)           # (N, E) one-hot of src[e]
    oh_dst = (node_iota == dst).astype(f32)           # (N, E) one-hot of dst[e]

    # deg[n] = sum_e w[e] * [dst[e]==n]  (+1 for the added self loop)
    deg = jnp.sum(oh_dst * w, axis=1, keepdims=True) + 1.0            # (N, 1)
    dinv = jnp.where(deg > 0.0,
                     jax.lax.rsqrt(jnp.maximum(deg, 1e-12)), 0.0)     # (N, 1)

    # gather dinv at src/dst per edge (sublane reduce, XLU)
    dinv_src = jnp.sum(oh_src * dinv, axis=0, keepdims=True)          # (1, E)
    dinv_dst = jnp.sum(oh_dst * dinv, axis=0, keepdims=True)          # (1, E)
    norm = dinv_src * w * dinv_dst                                     # (1, E)

    # A_hat[d, s] = sum_e norm[e] * [dst[e]==d] * [src[e]==s]   (trans-B MXU matmul)
    a_hat = jax.lax.dot_general(
        oh_dst * norm, oh_src,
        dimension_numbers=(((1,), (1,)), ((), ())),
        preferred_element_type=f32)                                    # (N, N)
    row_i = jax.lax.broadcasted_iota(jnp.int32, (n, n), 0)
    col_i = jax.lax.broadcasted_iota(jnp.int32, (n, n), 1)
    eye = (row_i == col_i).astype(f32)
    a_hat = a_hat + eye * (dinv * dinv)               # self-loop diagonal term

    # ---- GCN layer 1: relu(A_hat @ (Xe @ W1e + Xf @ W1f) + b1) -------------
    h = (jnp.dot(xe_ref[...], w1e_ref[...], preferred_element_type=f32)
         + jnp.dot(xf_ref[...], w1f_ref[...], preferred_element_type=f32))
    h = jnp.dot(a_hat, h, preferred_element_type=f32) + b1_ref[...]
    h = jnp.maximum(h, 0.0)
    # TODO(synk): nn.Dropout(p=0.5) is identity here (eval mode); training-mode
    # masking would use pltpu.prng_seed / pltpu.prng_random_bits.

    # ---- GCN layer 2: relu(A_hat @ (H @ W2) + b2) --------------------------
    h = jnp.dot(h, w2_ref[...], preferred_element_type=f32)
    h = jnp.dot(a_hat, h, preferred_element_type=f32) + b2_ref[...]
    h = jnp.maximum(h, 0.0)

    # ---- three 1-wide heads packed into one (H2, 3) matmul -----------------
    z = jnp.dot(h, wh_ref[...], preferred_element_type=f32) + bh_ref[...]
    s = pl.reciprocal(1.0 + jnp.exp(-z), approx=True)          # sigmoid via EUP

    # columns: [beta_initial, beta_decay_rate, gamma]; one fused clip + store.
    col = jax.lax.broadcasted_iota(jnp.int32, z.shape, 1)
    scale = jnp.where(col == 0, 2.0, jnp.where(col == 1, 0.1, 0.3))
    lo = jnp.where(col == 0, 1e-4, jnp.where(col == 1, 1e-6, 1e-4))
    out_ref[...] = jnp.clip(s * scale, lo, scale)              # hi == scale


def prepare_params(params, in_feats):
    """One-time parameter packing (kept OUT of the per-call path)."""
    w1 = params["w1"]
    h1 = w1.shape[1]
    w1_emb = w1[:in_feats, :]
    w1_feat = w1[in_feats:, :]
    if w1_feat.shape[0] == 0:                  # num_gnn_features == 0 path
        w1_feat = jnp.zeros((1, h1), w1.dtype)
    return {
        "w1_emb": w1_emb,
        "w1_feat": w1_feat,
        "b1": params["b1"],
        "w2": params["w2"],
        "b2": params["b2"],
        "wh": jnp.concatenate([params["w_bi"], params["w_bd"], params["w_g"]], axis=1),
        "bh": jnp.concatenate([params["b_bi"], params["b_bd"], params["b_g"]], axis=1),
    }


def parameter_predictor_gnn_time_beta(kparams, x_embeddings, edge_index,
                                      edge_weight=None, x_features=None):
    """JAX/Pallas equivalent of ParameterPredictorGNNTimeBeta.forward (eval).

    Returns (beta_initial, beta_decay_rate, gamma), each of shape (N,).
    """
    x_emb = x_embeddings.astype(jnp.float32)
    N = x_emb.shape[0]
    E = edge_index.shape[1]

    if x_features is not None:
        x_feat = x_features.astype(jnp.float32)
    else:
        x_feat = jnp.zeros((N, 1), jnp.float32)   # pairs with zero w1_feat rows

    ei = edge_index.astype(jnp.int32)
    if edge_weight is None:
        w_row = jnp.ones((1, E), jnp.float32)
    else:
        w_row = edge_weight.astype(jnp.float32).reshape(1, E)

    Fe = x_emb.shape[1]
    Ff = x_feat.shape[1]
    H1 = kparams["w1_emb"].shape[1]
    H2 = kparams["w2"].shape[1]

    flops = 2 * N * (N * (E + H1 + H2) + (Fe + Ff) * H1 + H1 * H2 + 3 * H2)
    bytes_accessed = 4 * (3 * E + N * (Fe + Ff + 3)
                          + (Fe + Ff) * H1 + H1 + H1 * H2 + H2 + 3 * H2 + 3)
    cost = pl.CostEstimate(flops=flops, transcendentals=4 * N,
                           bytes_accessed=bytes_accessed)

    vmem = pl.BlockSpec(memory_space=pltpu.MemorySpace.VMEM)
    out = pl.pallas_call(
        _gnn_kernel,
        out_shape=jax.ShapeDtypeStruct((N, 3), jnp.float32),
        in_specs=[vmem] * 11,
        out_specs=vmem,
        compiler_params=pltpu.CompilerParams(vmem_limit_bytes=32 * 1024 * 1024),
        cost_estimate=cost,
    )(ei, w_row, x_emb, x_feat,
      kparams["w1_emb"], kparams["w1_feat"], kparams["b1"],
      kparams["w2"], kparams["b2"], kparams["wh"], kparams["bh"])

    return out[:, 0], out[:, 1], out[:, 2]


# --------------------------- pure-jnp reference -----------------------------

def _gcn_normalized_adjacency(edge_index, edge_weight, num_nodes):
    """PyG gcn_norm (add self loops) as a dense normalized adjacency."""
    src = edge_index[0].astype(jnp.int32)
    dst = edge_index[1].astype(jnp.int32)
    if edge_weight is None:
        w = jnp.ones(src.shape[0], jnp.float32)
    else:
        w = edge_weight.astype(jnp.float32)

    loops = jnp.arange(num_nodes, dtype=jnp.int32)
    src = jnp.concatenate([src, loops])
    dst = jnp.concatenate([dst, loops])
    w = jnp.concatenate([w, jnp.ones(num_nodes, jnp.float32)])

    deg = jnp.zeros(num_nodes, jnp.float32).at[dst].add(w)
    dinv = jnp.where(deg > 0.0, jax.lax.rsqrt(jnp.maximum(deg, 1e-12)), 0.0)
    norm = dinv[src] * w * dinv[dst]
    return jnp.zeros((num_nodes, num_nodes), jnp.float32).at[dst, src].add(norm)


def _reference(params, a_hat, x):
    hp = jax.lax.Precision.HIGHEST
    h = jnp.maximum(
        jnp.dot(a_hat, jnp.dot(x, params["w1"], precision=hp), precision=hp)
        + params["b1"], 0.0)
    h = jnp.maximum(
        jnp.dot(a_hat, jnp.dot(h, params["w2"], precision=hp), precision=hp)
        + params["b2"], 0.0)

    def head(w, b, scale, lo, hi):
        z = jnp.dot(h, w, precision=hp) + b
        return jnp.clip(jax.nn.sigmoid(z)[:, 0] * scale, lo, hi)

    return (head(params["w_bi"], params["b_bi"], 2.0, 0.0001, 2.0),
            head(params["w_bd"], params["b_bd"], 0.1, 1e-06, 0.1),
            head(params["w_g"],  params["b_g"],  0.3, 0.0001, 0.3))


if __name__ == "__main__":
    N = 16                      # nodes
    in_feats = 8
    num_gnn_features = 4
    hidden = 32
    h2 = hidden // 2
    gcn_in = in_feats + num_gnn_features

    key = jax.random.PRNGKey(0)
    ks = jax.random.split(key, 12)

    x_embeddings = jax.random.normal(ks[0], (N, in_feats), jnp.float32)
    x_features = jax.random.normal(ks[1], (N, num_gnn_features), jnp.float32)

    # Ring graph, both directions (no pre-existing self loops).
    src = jnp.arange(N, dtype=jnp.int32)
    dst = (src + 1) % N
    edge_index = jnp.stack([jnp.concatenate([src, dst]),
                            jnp.concatenate([dst, src])])          # (2, 2N)
    edge_weight = jax.random.uniform(ks[2], (edge_index.shape[1],),
                                     jnp.float32, 0.5, 1.5)

    params = {
        "w1":   jax.random.normal(ks[3],  (gcn_in, hidden), jnp.float32) * 0.2,
        "b1":   jax.random.normal(ks[4],  (1, hidden),      jnp.float32) * 0.1,
        "w2":   jax.random.normal(ks[5],  (hidden, h2),     jnp.float32) * 0.2,
        "b2":   jax.random.normal(ks[6],  (1, h2),          jnp.float32) * 0.1,
        "w_bi": jax.random.normal(ks[7],  (h2, 1),          jnp.float32) * 0.2,
        "b_bi": jax.random.normal(ks[8],  (1, 1),           jnp.float32) * 0.1,
        "w_bd": jax.random.normal(ks[9],  (h2, 1),          jnp.float32) * 0.2,
        "b_bd": jax.random.normal(ks[10], (1, 1),           jnp.float32) * 0.1,
        "w_g":  jax.random.normal(ks[11], (h2, 1),          jnp.float32) * 0.2,
        "b_g":  jnp.zeros((1, 1), jnp.float32),
    }

    kparams = prepare_params(params, in_feats)      # one-time packing / split

    beta_i, beta_d, gamma = parameter_predictor_gnn_time_beta(
        kparams, x_embeddings, edge_index, edge_weight, x_features)
    beta_i, beta_d, gamma = jax.block_until_ready((beta_i, beta_d, gamma))

    # Correctness check against a pure-jnp reference.
    a_hat = _gcn_normalized_adjacency(edge_index, edge_weight, N)
    x_comb = jnp.concatenate([x_embeddings, x_features], axis=1)
    ref_bi, ref_bd, ref_g = _reference(params, a_hat, x_comb)

    assert beta_i.shape == (N,) and beta_d.shape == (N,) and gamma.shape == (N,)
    assert jnp.allclose(beta_i, ref_bi, rtol=5e-3, atol=5e-3)
    assert jnp.allclose(beta_d, ref_bd, rtol=5e-3, atol=5e-3)
    assert jnp.allclose(gamma,  ref_g,  rtol=5e-3, atol=5e-3)

    print("KERNEL_OK")
</pallas_src>

<mosaic_0001>
module attributes {stable_mosaic.version = 11 : i64} {
  func.func @_gnn_kernel(%arg0: memref<2x32xi32, #tpu.memory_space<vmem>>, %arg1: memref<1x32xf32, #tpu.memory_space<vmem>>, %arg2: memref<16x8xf32, #tpu.memory_space<vmem>>, %arg3: memref<16x4xf32, #tpu.memory_space<vmem>>, %arg4: memref<8x32xf32, #tpu.memory_space<vmem>>, %arg5: memref<4x32xf32, #tpu.memory_space<vmem>>, %arg6: memref<1x32xf32, #tpu.memory_space<vmem>>, %arg7: memref<32x16xf32, #tpu.memory_space<vmem>>, %arg8: memref<1x16xf32, #tpu.memory_space<vmem>>, %arg9: memref<16x3xf32, #tpu.memory_space<vmem>>, %arg10: memref<1x3xf32, #tpu.memory_space<vmem>>, %arg11: memref<16x3xf32, #tpu.memory_space<vmem>>) attributes {dimension_semantics = [], scalar_prefetch = 0 : i64, scratch_operands = 0 : i64, tpu.core_type = #tpu.core_type<tc>} {
    %c0 = arith.constant 0 : index
    %c0_0 = arith.constant 0 : index
    %0 = vector.load %arg0[%c0, %c0_0] : memref<2x32xi32, #tpu.memory_space<vmem>>, vector<2x32xi32>
    %1 = vector.extract_strided_slice %0 {offsets = [0, 0], sizes = [1, 32], strides = [1, 1]} : vector<2x32xi32> to vector<1x32xi32>
    %2 = vector.extract_strided_slice %0 {offsets = [1, 0], sizes = [1, 32], strides = [1, 1]} : vector<2x32xi32> to vector<1x32xi32>
    %c0_1 = arith.constant 0 : index
    %c0_2 = arith.constant 0 : index
    %3 = vector.load %arg1[%c0_1, %c0_2] : memref<1x32xf32, #tpu.memory_space<vmem>>, vector<1x32xf32>
    %4 = tpu.iota {dimensions = array<i32: 0>} : vector<16x32xi32>
    %5 = vector.broadcast %1 : vector<1x32xi32> to vector<16x32xi32>
    %6 = arith.cmpi eq, %4, %5 : vector<16x32xi32>
    %7 = arith.extui %6 : vector<16x32xi1> to vector<16x32xi32>
    %8 = arith.sitofp %7 : vector<16x32xi32> to vector<16x32xf32>
    %9 = vector.broadcast %2 : vector<1x32xi32> to vector<16x32xi32>
    %10 = arith.cmpi eq, %4, %9 : vector<16x32xi32>
    %11 = arith.extui %10 : vector<16x32xi1> to vector<16x32xi32>
    %12 = arith.sitofp %11 : vector<16x32xi32> to vector<16x32xf32>
    %13 = vector.broadcast %3 : vector<1x32xf32> to vector<16x32xf32>
    %14 = arith.mulf %12, %13 : vector<16x32xf32>
    %cst = arith.constant dense<0.000000e+00> : vector<16xf32>
    %15 = vector.multi_reduction <add>, %14, %cst [1] : vector<16x32xf32> to vector<16xf32>
    %16 = vector.shape_cast %15 : vector<16xf32> to vector<16x1xf32>
    %cst_3 = arith.constant 1.000000e+00 : f32
    %17 = vector.broadcast %cst_3 : f32 to vector<16x1xf32>
    %18 = arith.addf %16, %17 : vector<16x1xf32>
    %cst_4 = arith.constant 0.000000e+00 : f32
    %19 = vector.broadcast %cst_4 : f32 to vector<16x1xf32>
    %20 = arith.cmpf ogt, %18, %19 : vector<16x1xf32>
    %cst_5 = arith.constant 9.99999996E-13 : f32
    %21 = vector.broadcast %cst_5 : f32 to vector<16x1xf32>
    %22 = arith.maximumf %18, %21 : vector<16x1xf32>
    %23 = math.rsqrt %22 : vector<16x1xf32>
    %cst_6 = arith.constant 0.000000e+00 : f32
    %24 = vector.broadcast %cst_6 : f32 to vector<16x1xf32>
    %25 = arith.select %20, %23, %24 : vector<16x1xi1>, vector<16x1xf32>
    %26 = vector.broadcast %25 : vector<16x1xf32> to vector<16x32xf32>
    %27 = arith.mulf %8, %26 : vector<16x32xf32>
    %cst_7 = arith.constant dense<0.000000e+00> : vector<32xf32>
    %28 = vector.multi_reduction <add>, %27, %cst_7 [0] : vector<16x32xf32> to vector<32xf32>
    %29 = vector.shape_cast %28 : vector<32xf32> to vector<1x32xf32>
    %30 = vector.broadcast %25 : vector<16x1xf32> to vector<16x32xf32>
    %31 = arith.mulf %12, %30 : vector<16x32xf32>
    %cst_8 = arith.constant dense<0.000000e+00> : vector<32xf32>
    %32 = vector.multi_reduction <add>, %31, %cst_8 [0] : vector<16x32xf32> to vector<32xf32>
    %33 = vector.shape_cast %32 : vector<32xf32> to vector<1x32xf32>
    %34 = arith.mulf %29, %3 : vector<1x32xf32>
    %35 = arith.mulf %34, %33 : vector<1x32xf32>
    %36 = vector.broadcast %35 : vector<1x32xf32> to vector<16x32xf32>
    %37 = arith.mulf %12, %36 : vector<16x32xf32>
    %cst_9 = arith.constant dense<0.000000e+00> : vector<16x16xf32>
    %38 = tpu.matmul %37, %8, %cst_9 {dimension_numbers = #tpu.dot_dimension_numbers<[1], [1], [0], [0], [0, 0, 1, 0], [], []>} : vector<16x32xf32>, vector<16x32xf32>, vector<16x16xf32> -> vector<16x16xf32>
    %39 = tpu.iota {dimensions = array<i32: 0>} : vector<16x16xi32>
    %40 = tpu.iota {dimensions = array<i32: 1>} : vector<16x16xi32>
    %41 = arith.cmpi eq, %39, %40 : vector<16x16xi32>
    %42 = arith.extui %41 : vector<16x16xi1> to vector<16x16xi32>
    %43 = arith.sitofp %42 : vector<16x16xi32> to vector<16x16xf32>
    %44 = arith.mulf %25, %25 : vector<16x1xf32>
    %45 = vector.broadcast %44 : vector<16x1xf32> to vector<16x16xf32>
    %46 = arith.mulf %43, %45 : vector<16x16xf32>
    %47 = arith.addf %38, %46 : vector<16x16xf32>
    %c0_10 = arith.constant 0 : index
    %c0_11 = arith.constant 0 : index
    %48 = vector.load %arg2[%c0_10, %c0_11] : memref<16x8xf32, #tpu.memory_space<vmem>>, vector<16x8xf32>
    %c0_12 = arith.constant 0 : index
    %c0_13 = arith.constant 0 : index
    %49 = vector.load %arg4[%c0_12, %c0_13] : memref<8x32xf32, #tpu.memory_space<vmem>>, vector<8x32xf32>
    %cst_14 = arith.constant dense<0.000000e+00> : vector<16x32xf32>
    %50 = tpu.matmul %48, %49, %cst_14 {dimension_numbers = #tpu.dot_dimension_numbers<[1], [0], [0], [1], [0, 0, 1, 1], [], []>} : vector<16x8xf32>, vector<8x32xf32>, vector<16x32xf32> -> vector<16x32xf32>
    %c0_15 = arith.constant 0 : index
    %c0_16 = arith.constant 0 : index
    %51 = vector.load %arg3[%c0_15, %c0_16] : memref<16x4xf32, #tpu.memory_space<vmem>>, vector<16x4xf32>
    %c0_17 = arith.constant 0 : index
    %c0_18 = arith.constant 0 : index
    %52 = vector.load %arg5[%c0_17, %c0_18] : memref<4x32xf32, #tpu.memory_space<vmem>>, vector<4x32xf32>
    %cst_19 = arith.constant dense<0.000000e+00> : vector<16x32xf32>
    %53 = tpu.matmul %51, %52, %cst_19 {dimension_numbers = #tpu.dot_dimension_numbers<[1], [0], [0], [1], [0, 0, 1, 1], [], []>} : vector<16x4xf32>, vector<4x32xf32>, vector<16x32xf32> -> vector<16x32xf32>
    %54 = arith.addf %50, %53 : vector<16x32xf32>
    %cst_20 = arith.constant dense<0.000000e+00> : vector<16x32xf32>
    %55 = tpu.matmul %47, %54, %cst_20 {dimension_numbers = #tpu.dot_dimension_numbers<[1], [0], [0], [1], [0, 0, 1, 1], [], []>} : vector<16x16xf32>, vector<16x32xf32>, vector<16x32xf32> -> vector<16x32xf32>
    %c0_21 = arith.constant 0 : index
    %c0_22 = arith.constant 0 : index
    %56 = vector.load %arg6[%c0_21, %c0_22] : memref<1x32xf32, #tpu.memory_space<vmem>>, vector<1x32xf32>
    %57 = vector.broadcast %56 : vector<1x32xf32> to vector<16x32xf32>
    %58 = arith.addf %55, %57 : vector<16x32xf32>
    %cst_23 = arith.constant 0.000000e+00 : f32
    %59 = vector.broadcast %cst_23 : f32 to vector<16x32xf32>
    %60 = arith.maximumf %58, %59 : vector<16x32xf32>
    %c0_24 = arith.constant 0 : index
    %c0_25 = arith.constant 0 : index
    %61 = vector.load %arg7[%c0_24, %c0_25] : memref<32x16xf32, #tpu.memory_space<vmem>>, vector<32x16xf32>
    %cst_26 = arith.constant dense<0.000000e+00> : vector<16x16xf32>
    %62 = tpu.matmul %60, %61, %cst_26 {dimension_numbers = #tpu.dot_dimension_numbers<[1], [0], [0], [1], [0, 0, 1, 1], [], []>} : vector<16x32xf32>, vector<32x16xf32>, vector<16x16xf32> -> vector<16x16xf32>
    %cst_27 = arith.constant dense<0.000000e+00> : vector<16x16xf32>
    %63 = tpu.matmul %47, %62, %cst_27 {dimension_numbers = #tpu.dot_dimension_numbers<[1], [0], [0], [1], [0, 0, 1, 1], [], []>} : vector<16x16xf32>, vector<16x16xf32>, vector<16x16xf32> -> vector<16x16xf32>
    %c0_28 = arith.constant 0 : index
    %c0_29 = arith.constant 0 : index
    %64 = vector.load %arg8[%c0_28, %c0_29] : memref<1x16xf32, #tpu.memory_space<vmem>>, vector<1x16xf32>
    %65 = vector.broadcast %64 : vector<1x16xf32> to vector<16x16xf32>
    %66 = arith.addf %63, %65 : vector<16x16xf32>
    %cst_30 = arith.constant 0.000000e+00 : f32
    %67 = vector.broadcast %cst_30 : f32 to vector<16x16xf32>
    %68 = arith.maximumf %66, %67 : vector<16x16xf32>
    %c0_31 = arith.constant 0 : index
    %c0_32 = arith.constant 0 : index
    %69 = vector.load %arg9[%c0_31, %c0_32] : memref<16x3xf32, #tpu.memory_space<vmem>>, vector<16x3xf32>
    %cst_33 = arith.constant dense<0.000000e+00> : vector<16x3xf32>
    %70 = tpu.matmul %68, %69, %cst_33 {dimension_numbers = #tpu.dot_dimension_numbers<[1], [0], [0], [1], [0, 0, 1, 1], [], []>} : vector<16x16xf32>, vector<16x3xf32>, vector<16x3xf32> -> vector<16x3xf32>
    %c0_34 = arith.constant 0 : index
    %c0_35 = arith.constant 0 : index
    %71 = vector.load %arg10[%c0_34, %c0_35] : memref<1x3xf32, #tpu.memory_space<vmem>>, vector<1x3xf32>
    %72 = vector.broadcast %71 : vector<1x3xf32> to vector<16x3xf32>
    %73 = arith.addf %70, %72 : vector<16x3xf32>
    %cst_36 = arith.constant 0.000000e+00 : f32
    %74 = vector.broadcast %cst_36 : f32 to vector<16x3xf32>
    %75 = arith.subf %74, %73 : vector<16x3xf32>
    %76 = math.exp %75 : vector<16x3xf32>
    %cst_37 = arith.constant 1.000000e+00 : f32
    %77 = vector.broadcast %cst_37 : f32 to vector<16x3xf32>
    %78 = arith.addf %77, %76 : vector<16x3xf32>
    %79 = tpu.reciprocal %78 {approx = true} : vector<16x3xf32> -> vector<16x3xf32>
    %80 = tpu.iota {dimensions = array<i32: 1>} : vector<16x3xi32>
    %c0_i32 = arith.constant 0 : i32
    %81 = vector.broadcast %c0_i32 : i32 to vector<16x3xi32>
    %82 = arith.cmpi eq, %80, %81 : vector<16x3xi32>
    %c1_i32 = arith.constant 1 : i32
    %83 = vector.broadcast %c1_i32 : i32 to vector<16x3xi32>
    %84 = arith.cmpi eq, %80, %83 : vector<16x3xi32>
    %cst_38 = arith.constant 1.000000e-01 : f32
    %cst_39 = arith.constant 3.000000e-01 : f32
    %85 = vector.broadcast %cst_38 : f32 to vector<16x3xf32>
    %86 = vector.broadcast %cst_39 : f32 to vector<16x3xf32>
    %87 = arith.select %84, %85, %86 : vector<16x3xi1>, vector<16x3xf32>
    %cst_40 = arith.constant 2.000000e+00 : f32
    %88 = vector.broadcast %cst_40 : f32 to vector<16x3xf32>
    %89 = arith.select %82, %88, %87 : vector<16x3xi1>, vector<16x3xf32>
    %c0_i32_41 = arith.constant 0 : i32
    %90 = vector.broadcast %c0_i32_41 : i32 to vector<16x3xi32>
    %91 = arith.cmpi eq, %80, %90 : vector<16x3xi32>
    %c1_i32_42 = arith.constant 1 : i32
    %92 = vector.broadcast %c1_i32_42 : i32 to vector<16x3xi32>
    %93 = arith.cmpi eq, %80, %92 : vector<16x3xi32>
    %cst_43 = arith.constant 9.99999997E-7 : f32
    %cst_44 = arith.constant 9.99999974E-5 : f32
    %94 = vector.broadcast %cst_43 : f32 to vector<16x3xf32>
    %95 = vector.broadcast %cst_44 : f32 to vector<16x3xf32>
    %96 = arith.select %93, %94, %95 : vector<16x3xi1>, vector<16x3xf32>
    %cst_45 = arith.constant 9.99999974E-5 : f32
    %97 = vector.broadcast %cst_45 : f32 to vector<16x3xf32>
    %98 = arith.select %91, %97, %96 : vector<16x3xi1>, vector<16x3xf32>
    %99 = arith.mulf %79, %89 : vector<16x3xf32>
    %100 = arith.maximumf %98, %99 : vector<16x3xf32>
    %101 = arith.minimumf %89, %100 : vector<16x3xf32>
    %c0_46 = arith.constant 0 : index
    %c0_47 = arith.constant 0 : index
    %102 = vector.load %arg11[%c0_46, %c0_47] : memref<16x3xf32, #tpu.memory_space<vmem>>, vector<16x3xf32>
    tpu.vector_store %arg11[%c0_46, %c0_47], %101 {strides = array<i32>} : memref<16x3xf32, #tpu.memory_space<vmem>>, vector<16x3xf32>,
    return
  }
}

</mosaic_0001>

<bundles_post_ra>
// kernel: tpu_custom_call.1
= control target key start
LH: loop header
LB: loop body
LE: loop exit
PB: predicated region body
PF: predicated region fallthrough
CT: control target
= control target key end

     0   :  { %v40_v0 = vlaneseq  ;;  %v888_v9 = vmov 0.0   ;;  %vm71_vm2 = vcmask 261120   ;;  %vm230_vm7 = vcmask 1043456   ;;  %s1053_s0 = inlined_call_operand.vmem [shape: s32[2,32], index: 0, kind: input, shape index: {}]   ;;  %s1054_s1 = inlined_call_operand.vmem [shape: f32[1,32], index: 1, kind: input, shape index: {}]   ;;  %s1055_s5 = inlined_call_operand.vmem [shape: f32[4,32], index: 5, kind: input, shape index: {}]   ;;  %s1056_s3 = inlined_call_operand.vmem [shape: f32[16,4], index: 3, kind: input, shape index: {}]   ;;  %s1057_s4 = inlined_call_operand.vmem [shape: f32[8,32], index: 4, kind: input, shape index: {}]   ;;  %s1058_s2 = inlined_call_operand.vmem [shape: f32[16,8], index: 2, kind: input, shape index: {}]   ;;  %s1059_s7 = inlined_call_operand.vmem [shape: f32[32,16], index: 7, kind: input, shape index: {}]   ;;  %s1060_s6 = inlined_call_operand.vmem [shape: f32[1,32], index: 6, kind: input, shape index: {}]   ;;  %s1061_s9 = inlined_call_operand.vmem [shape: f32[16,3], index: 9, kind: input, shape index: {}]   ;;  %s1062_s8 = inlined_call_operand.vmem [shape: f32[1,16], index: 8, kind: input, shape index: {}]   ;;  %s1063_s10 = inlined_call_operand.vmem [shape: f32[1,3], index: 10, kind: input, shape index: {}]   ;;  %s1064_s11 = inlined_call_operand.vmem [shape: f32[16,3], index: 11, kind: output, shape index: {}]  }
   0x1   :  { %v38_v2 = vld [vmem:[%s1053_s0] sm:$0x3]  ;;  %vm223_vm8 = vcmask 31744   ;;  %v221_v24 = vld [vmem:[%s1056_s3 + $0x8] sm:$0xff]  ;;  %vm309_vm9 = vcmask 64512   ;;  %vm398_vm12 = vcmask 130048  }
   0x2   :  { %v41_v1 = vshrl.u32 %v40_v0, 7  ;;  %v957_v3 = vld [vmem:[%s1054_s1] sm:$0x1]  ;;  %v972_v17 = vand.u32 127, %v40_v0  ;;  %v218_v27 = vld [vmem:[%s1058_s2 + $0x8] sm:$0xff]  ;;  %vm763_vm15 = vcmask 23552  }
   0x3   :  { %v222_v22 = vld [vmem:[%s1055_s5] sm:$0xf] }
   0x4   :  { %v959_v4 = vsub.s32 0, %v41_v1  ;;  %v55_v5 = vsub.s32 1, %v41_v1  ;;  %v42_v6 = vadd.s32 8, %v41_v1  ;;  %vm120_vm3 = vcmp.eq.s32.totalorder %v41_v1, %v972_v17  ;;  %v220_v23 = vld [vmem:[%s1056_s3] sm:$0xff]  ;;  %831 = vmatprep.subr.msk.mxu1 %vm230_vm7, %v222_v22 }
   0x5   :  { %v774_v18 = vsel %vm120_vm3, 1.0, %v888_v9  ;;  %833 = vmatprep.mubr.msk.f32.mxu1 %vm223_vm8, %v220_v23  ;;  %v219_v25 = vld [vmem:[%s1057_s4] sm:$0xff]  ;;  %832 = vmatpush3.msk.msra.mxu1 %vm230_vm7, %v222_v22  ;;  %vm752_vm13 = vcmp.eq.s32.totalorder %v972_v17, 1  ;;  %vm751_vm14 = vcmp.eq.s32.totalorder %v972_v17, 0 }
   0x6   :  { %v56_v7 = vrot.slane %v38_v2, %v55_v5  ;;  %v67_v8 = vrot.slane %v957_v3, %v959_v4  ;;  %v46_v16 = vrot.slane %v38_v2, %v959_v4  ;;  %vm121_vm6 = vcmp.eq.s32.totalorder %v42_v6, %v972_v17  ;;  %v217_v26 = vld [vmem:[%s1058_s2] sm:$0xff]  ;;  %834 = vmatmul.mubr.msk.f32.vlgmr.msra.gmra.mxu1 %vm223_vm8, %v221_v24 }
   0x7   :  { %v775_v21 = vsel %vm121_vm6, 1.0, %v888_v9  ;;  %836 = vmatprep.subr.mxu1 %v219_v25  ;;  %838 = vmatprep.mubr.msk.f32.mxu1 %vm309_vm9, %v217_v26 }
   0x8   :  { %vm57_vm0 = vcmp.eq.s32.totalorder %v41_v1, %v56_v7  ;;  %vm58_vm1 = vcmp.eq.s32.totalorder %v42_v6, %v56_v7  ;;  %vm48_vm4 = vcmp.eq.s32.totalorder %v42_v6, %v46_v16  ;;  %vm47_vm5 = vcmp.eq.s32.totalorder %v41_v1, %v46_v16  ;;  %837 = vmatpush3.msra.mxu1 %v219_v25  ;;  %v484_v16 = vld [vmem:[%s1059_s7 + $0x10] sm:$0xff] }
   0x9   :  { %v963_v10 = vsel %vm57_vm0, 1.0, %v888_v9  ;;  %v965_v11 = vsel %vm58_vm1, 1.0, %v888_v9  ;;  %v771_v19 = vsel %vm48_vm4, 1.0, %v888_v9  ;;  %v770_v20 = vsel %vm47_vm5, 1.0, %v888_v9 }
   0xa   :  { %v69_v12 = vmul.f32 %v963_v10, %v67_v8  ;;  %v70_v13 = vmul.f32 %v965_v11, %v67_v8  ;;  %824 = vmatprep.subr.msk.mxu0 %vm71_vm2, %v771_v19  ;;  %839 = vmatmul.mubr.msk.f32.vlgmr.msra.gmra.mxu1 %vm309_vm9, %v218_v27 }
   0xb   :  { %825 = vmatpush3.xpose.msk.msra.mxu0 %vm71_vm2, %v771_v19 }
   0xc   :  { %v72_v14 = vsel %vm71_vm2, %v69_v12, 0.0  ;;  %v75_v15 = vsel %vm71_vm2, %v70_v13, 0.0  ;;  %826 = vmatprep.subr.msk.mxu0 %vm71_vm2, %v770_v20 }
   0xd   :  { %73 = vadd.xlane.f32.xlu0 %v72_v14 }
   0xf   :  { %827 = vmatpush3.xpose.msk.msra.mxu0 %vm71_vm2, %v770_v20 }
  0x11   :  { %76 = vadd.xlane.f32.xlu0 %v75_v15 }
  0x96   :  { %v74_v28 = vpop.xlane.xlu0 %73 }
  0x97   :  { %v78_v29 = vadd.f32 1.0, %v74_v28 }
  0x99   :  { %v82_v30 = vmax.f32 %v78_v29, 1e-12  ;;  %vm80_vm10 = vcmp.gt.f32.partialorder %v78_v29, 0.0  ;;  %v652_v29 = vld [vmem:[%s1061_s9 + $0x8] sm:$0xff] }
  0x9a   :  { %v77_v31 = vpop.xlane.xlu0 %76 }
  0x9b   :  { %876 = vrsqrt.f32 %v82_v30  ;;  %v79_v32 = vadd.f32 1.0, %v77_v31  ;;  %v651_v30 = vld [vmem:[%s1061_s9] sm:$0xff] }
  0x9c   :  { %v790_v31 = vld [vmem:[%s1062_s8] ss:$0 sm:$0xff] }
  0x9d   :  { %v83_v33 = vmax.f32 %v79_v32, 1e-12  ;;  %vm81_vm11 = vcmp.gt.f32.partialorder %v79_v32, 0.0 }
  0x9f   :  { %878 = vrsqrt.f32 %v83_v33 }
  0xa8   :  { %v877_v34 = vpop.eup %876 }
  0xa9   :  { %v86_v35 = vsel %vm80_vm10, %v877_v34, 0.0 }
  0xaa   :  { %v126_v36 = vmul.f32 %v86_v35, %v86_v35  ;;  %v99_v37 = vmul.f32 %v963_v10, %v86_v35  ;;  %v88_v39 = vmul.f32 %v770_v20, %v86_v35  ;;  %v785_v20 = vld [vmem:[%s1060_s6] ss:$0 sm:$0xff] }
  0xac   :  { %v879_v38 = vpop.eup %878  ;;  %v128_v40 = vmul.f32 %v774_v18, %v126_v36  ;;  %v101_v45 = vsel %vm71_vm2, %v99_v37, 0.0  ;;  %v90_v48 = vsel %vm71_vm2, %v88_v39, 0.0  ;;  %v483_v18 = vld [vmem:[%s1059_s7 + $0x8] sm:$0xff] }
  0xad   :  { %v87_v41 = vsel %vm81_vm11, %v879_v38, 0.0  ;;  %v793_v38 = vld [vmem:[%s1063_s10] ss:$0 sm:$0xff] }
  0xae   :  { %v100_v42 = vmul.f32 %v965_v11, %v87_v41  ;;  %v89_v43 = vmul.f32 %v771_v19, %v87_v41  ;;  %v127_v44 = vmul.f32 %v87_v41, %v87_v41  ;;  %v482_v19 = vld [vmem:[%s1059_s7] sm:$0xff] }
  0xb0   :  { %v102_v46 = vsel %vm71_vm2, %v100_v42, 0.0  ;;  %v91_v47 = vsel %vm71_vm2, %v89_v43, 0.0  ;;  %v129_v49 = vmul.f32 %v775_v21, %v127_v44 }
  0xb1   :  { %v103_v50 = vadd.f32 %v102_v46, %v101_v45  ;;  %v92_v51 = vadd.f32 %v91_v47, %v90_v48 }
  0xb3   :  { %v104_v52 = vrot.slane %v103_v50, 4  ;;  %v93_v53 = vrot.slane %v92_v51, 4 }
  0xb5   :  { %v105_v54 = vadd.f32 %v104_v52, %v103_v50  ;;  %v94_v55 = vadd.f32 %v93_v53, %v92_v51  ;;  %v889_v51 = vmov 0.3   ;;  %v890_v53 = vmov 0.0001  }
  0xb6   :  { %v753_v52 = vsel %vm752_vm13, 0.1, %v889_v51 }
  0xb7   :  { %v95_v56 = vrot.slane %v94_v55, 2  ;;  %v106_v57 = vrot.slane %v105_v54, 2 }
  0xb9   :  { %v96_v58 = vadd.f32 %v95_v56, %v94_v55  ;;  %v107_v59 = vadd.f32 %v106_v57, %v105_v54  ;;  %v755_v54 = vsel %vm752_vm13, 1e-06, %v890_v53  ;;  %v754_v55 = vsel %vm751_vm14, 2.0, %v753_v52 }
  0xba   :  { %v756_v57 = vsel %vm751_vm14, 0.0001, %v755_v54 }
  0xbb   :  { %v97_v60 = vrot.slane %v96_v58, 1  ;;  %v108_v61 = vrot.slane %v107_v59, 1 }
  0xbd   :  { %v98_v62 = vadd.f32 %v97_v60, %v96_v58  ;;  %v109_v63 = vadd.f32 %v108_v61, %v107_v59 }
  0xbf   :  { %v110_v0 = vmul.f32 %v98_v62, %v957_v3 }
  0xc1   :  { %v111_v1 = vmul.f32 %v110_v0, %v109_v63 }
  0xc3   :  { %v115_v2 = vrot.slane %v111_v1, %v959_v4 }
  0xc5   :  { %v116_v5 = vmul.f32 %v963_v10, %v115_v2  ;;  %v117_v6 = vmul.f32 %v965_v11, %v115_v2  ;;  %v485_v11 = vld [vmem:[%s1059_s7 + $0x18] sm:$0xff] }
  0xc6   :  { %v835_v7 = vpop.f32.mrf.mxu1  ;;  %848 = vmatprep.subr.mxu0 %v485_v11 }
  0xc7   :  { %828 = vmatprep.mubr.msk.f32.mxu0 %vm71_vm2, %v116_v5 }
  0xc8   :  { %829 = vmatmul.mubr.msk.f32.vlgmr.msra.gmra.mxu0 %vm71_vm2, %v117_v6  ;;  %v300_v8 = vpop.f32.mrf.mxu1 }
  0xc9   :  { %849 = vmatpush3.msra.mxu0 %v485_v11 }
  0xca   :  { %v840_v9 = vpop.f32.mrf.mxu1  ;;  %850 = vmatprep.subr.mxu0 %v484_v16 }
  0xcb   :  { %v388_v12 = vadd.f32 %v840_v9, %v835_v7  ;;  %851 = vmatpush3.msra.mxu0 %v484_v16 }
  0xcc   :  { %v382_v13 = vpop.f32.mrf.mxu1  ;;  %852 = vmatprep.subr.mxu0 %v483_v18 }
  0xcd   :  { %v383_v14 = vadd.f32 %v382_v13, %v300_v8  ;;  %841 = vmatprep.subr.mxu1 %v388_v12  ;;  %853 = vmatpush3.msra.mxu0 %v483_v18 }
  0xce   :  { %842 = vmatpush3.msra.mxu1 %v388_v12  ;;  %854 = vmatprep.subr.mxu0 %v482_v19 }
  0xcf   :  { %843 = vmatprep.subr.mxu1 %v383_v14  ;;  %855 = vmatpush3.msra.mxu0 %v482_v19 }
  0xd0   :  { %844 = vmatpush3.msra.mxu1 %v383_v14 }
 0x188   :  { %v830_v3 = vpop.f32.mrf.mxu0 }
 0x189   :  { %v214_v15 = vadd.f32 %v830_v3, %v129_v49 }
 0x18a   :  { %v208_v4 = vpop.f32.mrf.mxu0 }
 0x18b   :  { %v209_v10 = vadd.f32 %v208_v4, %v128_v40 }
 0x18d   :  { %845 = vmatprep.mubr.msk.f32.mxu1 %vm398_vm12, %v209_v10 }
 0x18e   :  { %846 = vmatmul.mubr.msk.f32.vlgmr.msra.gmra.mxu1 %vm398_vm12, %v214_v15 }
 0x18f   :  { %863 = vmatprep.mubr.msk.f32.mxu1 %vm398_vm12, %v209_v10 }
 0x24e   :  { %v847_v21 = vpop.f32.mrf.mxu1 }
 0x24f   :  { %v477_v22 = vadd.f32 %v847_v21, %v785_v20 }
 0x250   :  { %v471_v23 = vpop.f32.mrf.mxu1 }
 0x251   :  { %v472_v24 = vadd.f32 %v785_v20, %v471_v23  ;;  %v481_v26 = vmax.f32 %v477_v22, 0.0 }
 0x253   :  { %v480_v25 = vmax.f32 %v472_v24, 0.0 }
 0x255   :  { %856 = vmatprep.mubr.msk.f32.mxu0 %vm71_vm2, %v480_v25 }
 0x256   :  { %857 = vmatmul.mubr.msk.f32.vlgmr.msra.gmra.mxu0 %vm71_vm2, %v481_v26 }
 0x316   :  { %v858_v27 = vpop.f32.mrf.mxu0 }
 0x317   :  { %859 = vmatprep.subr.mxu1 %v858_v27 }
 0x318   :  { %v558_v28 = vpop.f32.mrf.mxu0  ;;  %860 = vmatpush3.msra.mxu1 %v858_v27 }
 0x319   :  { %861 = vmatprep.subr.mxu1 %v558_v28 }
 0x31a   :  { %862 = vmatpush3.msra.mxu1 %v558_v28 }
 0x31b   :  { %864 = vmatmul.mubr.msk.f32.vlgmr.msra.gmra.mxu1 %vm398_vm12, %v214_v15  ;;  %866 = vmatprep.subr.mxu1 %v652_v29 }
 0x31c   :  { %867 = vmatpush3.msra.mxu1 %v652_v29 }
 0x31d   :  { %868 = vmatprep.subr.mxu1 %v651_v30 }
 0x31e   :  { %869 = vmatpush3.msra.mxu1 %v651_v30 }
 0x3db   :  { %v865_v32 = vpop.f32.mrf.mxu1 }
 0x3dc   :  { %v646_v33 = vadd.f32 %v865_v32, %v790_v31 }
 0x3dd   :  { %v640_v34 = vpop.f32.mrf.mxu1 }
 0x3de   :  { %v641_v35 = vadd.f32 %v790_v31, %v640_v34  ;;  %v650_v37 = vmax.f32 %v646_v33, 0.0 }
 0x3e0   :  { %v649_v36 = vmax.f32 %v641_v35, 0.0 }
 0x3e2   :  { %870 = vmatprep.mubr.msk.f32.mxu1 %vm398_vm12, %v649_v36 }
 0x3e3   :  { %871 = vmatmul.mubr.msk.f32.vlgmr.msra.gmra.mxu1 %vm398_vm12, %v650_v37 }
 0x4a3   :  { %v872_v39 = vpop.f32.mrf.mxu1 }
 0x4a4   :  { %v738_v40 = vadd.f32 %v872_v39, %v793_v38 }
 0x4a5   :  { %v732_v41 = vpop.f32.mrf.mxu1 }
 0x4a6   :  { %v742_v42 = vsub.f32 0.0, %v738_v40  ;;  %v733_v43 = vadd.f32 %v793_v38, %v732_v41 }
 0x4a8   :  { %v745_v44 = vmul.f32 1.442695, %v742_v42  ;;  %v741_v45 = vsub.f32 0.0, %v733_v43 }
 0x4aa   :  { %880 = vpow2.f32 %v745_v44  ;;  %v743_v46 = vmul.f32 1.442695, %v741_v45 }
 0x4ac   :  { %882 = vpow2.f32 %v743_v46 }
 0x4b7   :  { %v881_v47 = vpop.eup %880 }
 0x4b8   :  { %v748_v48 = vadd.f32 1.0, %v881_v47 }
 0x4b9   :  { %v883_v49 = vpop.eup %882 }
 0x4ba   :  { %884 = vrcp.f32 %v748_v48  ;;  %v747_v50 = vadd.f32 1.0, %v883_v49 }
 0x4bc   :  { %886 = vrcp.f32 %v747_v50 }
 0x4c7   :  { %v885_v56 = vpop.eup %884 }
 0x4c8   :  { %v758_v58 = vmul.f32 %v885_v56, %v754_v55 }
 0x4c9   :  { %v887_v59 = vpop.eup %886 }
 0x4ca   :  { %v760_v60 = vmax.f32 %v756_v57, %v758_v58  ;;  %v757_v61 = vmul.f32 %v887_v59, %v754_v55 }
 0x4cc   :  { %v762_v62 = vmin.f32 %v754_v55, %v760_v60  ;;  %v759_v63 = vmax.f32 %v756_v57, %v757_v61 }
 0x4ce   :  { %765 = vst.msk [vmem:[%s1064_s11 + $0x8] sm:$0xff] %vm763_vm15, %v762_v62  ;;  %v761_v0 = vmin.f32 %v754_v55, %v759_v63 }
 0x4d0   :  { %764 = vst.msk [vmem:[%s1064_s11] sm:$0xff] %vm763_vm15, %v761_v0 }

</bundles_post_ra>
